<compile_context>
chip_gen: v7x
topology: tpu7x:2x2x1
jax: 0.10.0
libtpu: 0.0.40
codegen_flags: <defaults>
</compile_context>

<pallas_src>
import functools

import numpy as np

import jax
import jax.numpy as jnp
from jax.experimental import pallas as pl
from jax.experimental.pallas import tpu as pltpu


def _round_up(x, m):
    return ((x + m - 1) // m) * m


def _exact_mxu_passes(dtype):
    """Number of bf16 pieces needed to push `dtype` through the MXU exactly."""
    if dtype == jnp.float32:
        return 3        # 24-bit mantissa -> 3 x 8-bit bf16 pieces
    if dtype == jnp.float16:
        return 2        # 11-bit mantissa
    return 1            # bf16 (or narrower) passes through directly


def _build_permutation(irreps, dtype=jnp.bfloat16):
    """(C, C) 0/1 matrix P with (x @ P)[:, m*d_tot+off_k+j] = x[:, ix_k+m*d_k+j]."""
    mul = irreps[0][0]
    d_tot = sum(d for _, d in irreps)
    c_tot = mul * d_tot

    ix_offsets = []
    ix = 0
    for _, d in irreps:
        ix_offsets.append(ix)
        ix += mul * d

    src = []
    for m in range(mul):                                # output is m-major ...
        for ix_k, (_, d) in zip(ix_offsets, irreps):    # ... then irrep-major
            for j in range(d):
                src.append(ix_k + m * d + j)

    p = np.zeros((c_tot, c_tot), dtype=np.float32)
    p[np.asarray(src), np.arange(c_tot)] = 1.0          # out[:, jo] = x[:, src[jo]]
    return jnp.asarray(p, dtype=dtype)


def _choose_block_rows(n, block_n, sub):
    """Row-tile size: sublane-aligned, big for HBM amortization, >=2 grid steps
    (two v7x TensorCores) whenever the input is large enough to split."""
    n_cap = _round_up(n, sub)
    bn = max(sub, (min(block_n, n_cap) // sub) * sub)
    if bn >= n_cap and n_cap >= 4 * sub:
        bn = _round_up((n_cap + 1) // 2, sub)
    return bn


def _permute_kernel(p_ref, x_ref, o_ref, *, passes, row_chunk):
    """o_ref = x_ref @ P, computed in row sub-chunks on the MXU.

    For f32 (passes=3) the value is decomposed into exact bf16 pieces
    (hi/mid/lo); since P is 0/1, each matmul copies the piece exactly into the
    f32 accumulator and the pieces re-sum to the original f32 value exactly.
    """
    p = p_ref[...]                                   # (C, C) bf16 0/1 matrix
    n_rows = x_ref.shape[0]
    for r0 in range(0, n_rows, row_chunk):           # static unroll, static slices
        rows = slice(r0, r0 + row_chunk)
        rem = x_ref[rows, :].astype(jnp.float32)
        acc = None
        for i in range(passes):
            piece = rem.astype(jnp.bfloat16)
            part = jnp.dot(piece, p, preferred_element_type=jnp.float32)
            acc = part if acc is None else acc + part
            if i + 1 < passes:
                rem = rem - piece.astype(jnp.float32)
        o_ref[rows, :] = acc.astype(o_ref.dtype)


def irreps_reshape(x, irreps, block_n=4096):
    """Pallas wrapper reproducing the torch `reshape` module forward.

    x: (N, sum(mul*d)) array; irreps: list of (mul, d) pairs with equal muls.
    returns: (N, mul, sum(d)) array.
    """
    muls = {m for m, _ in irreps}
    assert len(muls) == 1, "all multiplicities must be equal"
    mul = irreps[0][0]
    d_tot = sum(d for _, d in irreps)
    c_tot = mul * d_tot

    n = x.shape[0]
    assert x.shape[1] == c_tot

    # dtype-aware sublane multiple: 8 rows for f32, 16 for bf16/f16, 32 for 1B.
    sub = max(8, 32 // max(1, x.dtype.itemsize))
    bn = _choose_block_rows(n, block_n, sub)
    grid = (pl.cdiv(n, bn),)                 # partial last block handled by Pallas

    # Inner row sub-chunk bounds vreg pressure without shrinking the DMA tile.
    row_chunk = bn
    for cand in (512, 256, 128):
        if bn > cand and bn % cand == 0:
            row_chunk = cand
            break

    p = _build_permutation(tuple(irreps), dtype=jnp.bfloat16)
    kernel = functools.partial(_permute_kernel,
                               passes=_exact_mxu_passes(x.dtype),
                               row_chunk=row_chunk)

    out2d = pl.pallas_call(
        kernel,
        out_shape=jax.ShapeDtypeStruct((n, c_tot), x.dtype),
        grid=grid,
        in_specs=[
            pl.BlockSpec((c_tot, c_tot), lambda i: (0, 0)),   # P: resident in VMEM
            pl.BlockSpec((bn, c_tot), lambda i: (i, 0)),      # x row-tile
        ],
        out_specs=pl.BlockSpec((bn, c_tot), lambda i: (i, 0)),
        compiler_params=pltpu.CompilerParams(
            dimension_semantics=("parallel",)),
    )(p, x)

    # Free contiguous metadata reshape to the module's (N, mul, d_tot) output.
    return out2d.reshape(n, mul, d_tot)


def irreps_reshape_ref(x, irreps):
    """Pure-JAX reference mirroring the torch loop."""
    ix = 0
    pieces = []
    for mul, d in irreps:
        field = x[:, ix:ix + mul * d]
        ix += mul * d
        pieces.append(field.reshape(-1, mul, d))
    return jnp.concatenate(pieces, axis=-1)


if __name__ == "__main__":
    # Irreps consistent with equiformer usage, e.g. "8x0e + 8x1e + 8x2e":
    # (mul, ir.dim) pairs with equal mul.
    irreps = [(8, 1), (8, 3), (8, 5)]         # dims of l = 0, 1, 2 irreps
    mul = 8
    d_tot = sum(d for _, d in irreps)         # 9
    c_tot = mul * d_tot                       # 72

    key = jax.random.PRNGKey(0)
    k1, k2, k3 = jax.random.split(key, 3)

    # Case 1: small ragged N (partial last row-block, no jnp.pad copy).
    n1 = 50
    x1 = jax.random.normal(k1, (n1, c_tot), dtype=jnp.float32)
    out1 = jax.block_until_ready(irreps_reshape(x1, irreps))
    exp1 = irreps_reshape_ref(x1, irreps)
    assert out1.shape == (n1, mul, d_tot)
    assert jnp.allclose(out1, exp1), "mismatch vs reference (f32, ragged N)"

    # Case 2: multi-step grid.
    n2 = 2048
    x2 = jax.random.normal(k2, (n2, c_tot), dtype=jnp.float32)
    out2 = jax.block_until_ready(irreps_reshape(x2, irreps, block_n=1024))
    exp2 = irreps_reshape_ref(x2, irreps)
    assert out2.shape == (n2, mul, d_tot)
    assert jnp.allclose(out2, exp2), "mismatch vs reference (f32, multi-tile)"

    # Case 3: bf16 input (single MXU pass, 16-row sublane rounding).
    n3 = 64
    x3 = jax.random.normal(k3, (n3, c_tot), dtype=jnp.float32).astype(jnp.bfloat16)
    out3 = jax.block_until_ready(irreps_reshape(x3, irreps))
    exp3 = irreps_reshape_ref(x3, irreps)
    assert out3.shape == (n3, mul, d_tot)
    assert jnp.allclose(out3.astype(jnp.float32), exp3.astype(jnp.float32)), \
        "mismatch vs reference (bf16)"

    print("KERNEL_OK")
</pallas_src>

<mosaic_0001>
module attributes {stable_mosaic.version = 11 : i64} {
  func.func @_permute_kernel(%arg0: i32, %arg1: memref<72x72xbf16, #tpu.memory_space<vmem>>, %arg2: memref<32x72xf32, #tpu.memory_space<vmem>>, %arg3: memref<32x72xf32, #tpu.memory_space<vmem>>) attributes {dimension_semantics = [#tpu.dimension_semantics<parallel>], iteration_bounds = array<i64: 2>, scalar_prefetch = 0 : i64, scratch_operands = 0 : i64, tpu.core_type = #tpu.core_type<tc>, window_params = [{pipeline_mode = #tpu.pipeline_mode<synchronous>, transform_indices = @transform_0, window_bounds = array<i64: 72, 72>}, {transform_indices = @transform_1, window_bounds = array<i64: 32, 72>}, {transform_indices = @transform_2, window_bounds = array<i64: 32, 72>}]} {
    %c0 = arith.constant 0 : index
    %c0_0 = arith.constant 0 : index
    %0 = vector.load %arg1[%c0, %c0_0] : memref<72x72xbf16, #tpu.memory_space<vmem>>, vector<72x72xbf16>
    %c0_1 = arith.constant 0 : index
    %c0_2 = arith.constant 0 : index
    %1 = vector.load %arg2[%c0_1, %c0_2] : memref<32x72xf32, #tpu.memory_space<vmem>>, vector<32x72xf32>
    %2 = arith.truncf %1 : vector<32x72xf32> to vector<32x72xbf16>
    %cst = arith.constant dense<0.000000e+00> : vector<32x72xf32>
    %3 = tpu.matmul %2, %0, %cst {dimension_numbers = #tpu.dot_dimension_numbers<[1], [0], [0], [1], [0, 0, 1, 1], [], []>} : vector<32x72xbf16>, vector<72x72xbf16>, vector<32x72xf32> -> vector<32x72xf32>
    %4 = arith.extf %2 : vector<32x72xbf16> to vector<32x72xf32>
    %5 = arith.subf %1, %4 : vector<32x72xf32>
    %6 = arith.truncf %5 : vector<32x72xf32> to vector<32x72xbf16>
    %cst_3 = arith.constant dense<0.000000e+00> : vector<32x72xf32>
    %7 = tpu.matmul %6, %0, %cst_3 {dimension_numbers = #tpu.dot_dimension_numbers<[1], [0], [0], [1], [0, 0, 1, 1], [], []>} : vector<32x72xbf16>, vector<72x72xbf16>, vector<32x72xf32> -> vector<32x72xf32>
    %8 = arith.addf %3, %7 : vector<32x72xf32>
    %9 = arith.extf %6 : vector<32x72xbf16> to vector<32x72xf32>
    %10 = arith.subf %5, %9 : vector<32x72xf32>
    %11 = arith.truncf %10 : vector<32x72xf32> to vector<32x72xbf16>
    %cst_4 = arith.constant dense<0.000000e+00> : vector<32x72xf32>
    %12 = tpu.matmul %11, %0, %cst_4 {dimension_numbers = #tpu.dot_dimension_numbers<[1], [0], [0], [1], [0, 0, 1, 1], [], []>} : vector<32x72xbf16>, vector<72x72xbf16>, vector<32x72xf32> -> vector<32x72xf32>
    %13 = arith.addf %8, %12 : vector<32x72xf32>
    %c0_5 = arith.constant 0 : index
    %c0_6 = arith.constant 0 : index
    %14 = vector.load %arg3[%c0_5, %c0_6] : memref<32x72xf32, #tpu.memory_space<vmem>>, vector<32x72xf32>
    tpu.vector_store %arg3[%c0_5, %c0_6], %13 {strides = array<i32>} : memref<32x72xf32, #tpu.memory_space<vmem>>, vector<32x72xf32>,
    return
  }
  func.func @transform_0(%arg0: i32) -> (i32, i32) {
    %c0_i32 = arith.constant 0 : i32
    %c0_i32_0 = arith.constant 0 : i32
    %c0_i32_1 = arith.constant 0 : i32
    return %c0_i32, %c0_i32_0 : i32, i32
  }
  func.func @transform_1(%arg0: i32) -> (i32, i32) {
    %c0_i32 = arith.constant 0 : i32
    %c0_i32_0 = arith.constant 0 : i32
    return %arg0, %c0_i32 : i32, i32
  }
  func.func @transform_2(%arg0: i32) -> (i32, i32) {
    %c0_i32 = arith.constant 0 : i32
    %c0_i32_0 = arith.constant 0 : i32
    return %arg0, %c0_i32 : i32, i32
  }
}

</mosaic_0001>

<bundles_post_ra>
// kernel: tpu_custom_call.1
= control target key start
LH: loop header
LB: loop body
LE: loop exit
PB: predicated region body
PF: predicated region fallthrough
CT: control target
= control target key end

     0   :  { %7 = vsyncpa [#allocation3], 0  ;;  %s1093_s0 = inlined_call_operand.hbm [shape: bf16[72,72], index: 0, kind: input, shape index: {}]   ;;  %s1094_s1 = inlined_call_operand.hbm [shape: f32[50,72], index: 1, kind: input, shape index: {}]   ;;  %s1095_s2 = inlined_call_operand.hbm [shape: f32[50,72], index: 2, kind: output, shape index: {}]  }
   0x1   :  { %8 = vsyncpa [#allocation6], 0 }
   0x2   :  { %10 = vsyncpa [#allocation6 + $0x1], 0 }
   0x3   :  { %11 = vsyncpa [#allocation4], 0 }
   0x4   :  { %13 = vsyncpa [#allocation4 + $0x1], 0  ;;  %s863_s9 = smov 0   ;;  %s865_s10 = smov 0  }
   0x5   :  { %s867_s11 = smov 0   ;;  %s869_s12 = smov 0  }
   0x6 LB: > { %s884_s13 = sadd.s32 4294967295, %s837_s12   ;;  %s539_s14 = sadd.s32 4294967294, %s837_s12   ;;  %s837_s12 = sphi %s869_s12, %s1115_s12   ;;  %s833_s11 = sphi %s867_s11, %s1114_s11   ;;  %s829_s10 = sphi %s865_s10, %s1113_s10   ;;  %s825_s9 = sphi %s863_s9, %s1112_s9  }
   0x7   : > { %s888_s15 = sadd.s32 1, %s837_s12   ;;  %s47_s16 = sadd.s32 1, %s833_s11 }
   0x8   : > { %s44_s17 = ssub.s32 %s837_s12, %s888_s15  ;;  %p54_p0 = scmp.ne.s32.totalorder %s833_s11, %s829_s10 }
   0x9   : > { %p45_p1 = scmp.eq.s32.totalorder %s44_s17, 0  ;;  %p55_p2 = scmp.eq.s32.totalorder %s837_s12, 0 }
   0xa   : > { %p60_p3 = scmp.ne.s32.totalorder %s829_s10, %s825_s9  ;;  %p1096_p4 = scmp.eq.s32.totalorder %s884_s13, 0 }
   0xb   : > { %s900_s18 = scalar_select %p45_p1, %s833_s11, %s47_s16  }
   0xc   : > { %p902_p5 = por %p55_p2, %p54_p0  ;;  %p908_p6 = por %p1096_p4, %p60_p3 }
   0xd   : > { %p84_p7 = scmp.eq.s32.totalorder %s884_s13, 1  ;;  %p90_p8 = scmp.eq.s32.totalorder %s539_s14, 1 }
   0xe   : > { %s1099_s19 = scalar_select %p902_p5, 1, 0 }
   0xf   : > { %s1100_s20 = scalar_select %p908_p6, 1, 0 }
  0x10   : > { %p540_p9 = scmp.ge.s32.totalorder %s837_s12, 1  ;;  %p97_p10 = scmp.lt.s32.totalorder %s837_s12, 3 }
  0x11   : > { %p915_p11 = por %p84_p7, %p54_p0  ;;  %p919_p12 = por %p90_p8, %p60_p3 }
  0x12   : > { %p923_p13 = pnand %p540_p9, %p97_p10  ;;  %s839_s24 = smov [#allocation2]  }
  0x13   : > { %s1101_s21 = scalar_select %p915_p11, 1, 0 }
  0x14   : > { %s1102_s22 = scalar_select %p919_p12, 1, 0 }
  0x15   : > { %s1103_s23 = scalar_select %p923_p13, 1, 0 }
  0x16   : > { %p656_p1 = pneg %p923_p13  ;;  %s109_s25 = sshll.u32 %s839_s24, 4  ;;  %s110_s25 = int_to_ptr.vmem [resolvable:$true] %s109_s25 }
  0x17   : > { %s711_s29 = scalar_lea.hbm %s1093_s0, 576 }
  0x18   : > { %p931_p2 = pnand %p656_p1, %p1096_p4  ;;  %p712_p0 = scmp.ne.s32.totalorder %s1093_s0, %s711_s29 }
  0x19   : > { %p718_p9 = scmp.lt.u32.totalorder %s711_s29, %s1093_s0 }
  0x1a   : > { %p713_p3 = pneg %p931_p2 }
  0x1c   : > { %p714_p7 = pnand %p713_p3, %p712_p0 }
  0x1e   : > { %p715_p8 = pneg %p714_p7 }
  0x20   : > { %p720_p10 = pnand %p718_p9, %p715_p8 }
  0x22   : > { %723 = shalt.err (!%p720_p10)
}
  0x23   : > { %s724_s6 = scalar_lea.vmem %s110_s25, 576  ;;  %p732_p11 = scmp.lt.s32.totalorder %s110_s25, %s110_s25 }
  0x24   : > { %p725_p1 = scmp.ne.s32.totalorder %s110_s25, %s724_s6  ;;  %p733_p6 = scmp.lt.s32.totalorder %s724_s6, %s724_s6 }
  0x26   : > { %p727_p4 = pnand %p725_p1, %p713_p3  ;;  %p734_p13 = por %p733_p6, %p732_p11 }
  0x28   : > { %p728_p12 = pneg %p727_p4 }
  0x2a   : > { %p735_p5 = pnand %p734_p13, %p728_p12 }
  0x2c   : > { %738 = shalt.err (!%p735_p5)
}
  0x2d   : > { %s840_s7 = smov 64   ;;  %s841_s8 = smov 4  }
  0x2e   : > { %659 = dma.hbm_to_vmem [thread:$0]  (!%p931_p2), %s1093_s0, 576, %s110_s25, [#allocation3], %s840_s7, %s840_s7, %s841_s8  }
  0x2f   : > { %p542_p0 = scmp.ge.s32.totalorder %s837_s12, 2 }
  0x30   : > { %p1105_p4 = scmp.ne.s32.totalorder (!%p542_p0), %s1099_s19, 0 }
  0x31   : > { %119 = sbr.rel (%p542_p0) target bundleno = 91 (0x5b), region = 20 }
  0x38   : > { %122 = sbr.rel (!%p1105_p4) target bundleno = 91 (0x5b), region = 24  ;;  %s123_s17 = sand.u32 (%p1105_p4), 1, %s833_s11  }
  0x39   : > { %s544_s24 = sshll.u32 (%p1105_p4), %s837_s12, 2  ;;  %s543_s27 = sshll.u32 (%p1105_p4), %s123_s17, 5 }
  0x3a   : > { %s129_s28 = ssub.s32 (%p1105_p4), 7, %s544_s24  ;;  %s961_s29 = scalar_lea.sflag (%p1105_p4), [#allocation6], %s123_s17 }
  0x3b   : > { %p130_p5 = scmp.lt.s32.totalorder (%p1105_p4), %s129_s28, 4  ;;  %s127_s30 = scalar_lea.vmem (%p1105_p4), [#allocation5], %s543_s27 }
  0x3f   : > { %s1117_s28 = smov (!%p130_p5, %s129_s28), 4 }
  0x40   : > { %s958_s26 = sshll.u32 %s1117_s28, 7 }
  0x41   : > { %s134_s25 = ssub.s32 512, %s958_s26 }
  0x42   : > { %135 = vsyncadd %s961_s29, %s134_s25  ;;  %p546_p6 = scmp.ne.s32.totalorder %s958_s26, 0  ;;  %s574_s19 = sshll.u32 %s837_s12, 9 }
  0x43   : > { %s969_s5 = scalar_lea.hbm %s1094_s1, %s574_s19  ;;  %s140_s6 = sshll.u32 %s127_s30, 4  ;;  %s971_s6 = int_to_ptr.vmem [resolvable:$true] %s140_s6 }
  0x44   : > { %s739_s7 = scalar_lea.hbm %s969_s5, %s958_s26  ;;  %s743_s16 = scalar_lea.hbm %s1094_s1, 896 }
  0x45   : > { %p740_p11 = scmp.ne.s32.totalorder %s969_s5, %s739_s7  ;;  %p744_p2 = scmp.lt.u32.totalorder %s969_s5, %s1094_s1 }
  0x46   : > { %p745_p3 = scmp.lt.u32.totalorder %s743_s16, %s739_s7  ;;  %p747_p8 = scmp.lt.u32.totalorder %s739_s7, %s969_s5 }
  0x47   : > { %p741_p12 = pnand %p740_p11, %p546_p6 }
  0x48   : > { %p746_p7 = por %p745_p3, %p744_p2 }
  0x49   : > { %p742_p13 = pneg %p741_p12 }
  0x4a   : > { %p748_p9 = por %p747_p8, %p746_p7 }
  0x4c   : > { %p749_p10 = pnand %p748_p9, %p742_p13 }
  0x4e   : > { %752 = shalt.err (!%p749_p10)
}
  0x4f   : > { %s753_s27 = scalar_lea.vmem %s971_s6, %s958_s26  ;;  %s842_s28 = smov [#allocation5]  }
  0x50   : > { %p754_p1 = scmp.ne.s32.totalorder %s971_s6, %s753_s27  ;;  %s757_s25 = sshll.u32 %s842_s28, 4  ;;  %s758_s25 = int_to_ptr.vmem [resolvable:$false] %s757_s25 }
  0x51   : > { %s759_s30 = scalar_lea.vmem %s758_s25, 1024  ;;  %p760_p11 = scmp.lt.s32.totalorder %s971_s6, %s758_s25 }
  0x52   : > { %p755_p4 = pnand %p754_p1, %p546_p6  ;;  %p761_p12 = scmp.lt.s32.totalorder %s759_s30, %s753_s27 }
  0x54   : > { %p756_p5 = pneg %p755_p4  ;;  %p762_p2 = por %p761_p12, %p760_p11 }
  0x56   : > { %p763_p3 = pnand %p762_p2, %p756_p5 }
  0x58   : > { %766 = shalt.err (!%p763_p3)
}
  0x59   : > { %s843_s19 = smov 128   ;;  %s844_s3 = smov 8  }
  0x5a   : > { %146 = dma.hbm_to_vmem [thread:$0]  (%p546_p6), %s969_s5, %s958_s26, %s971_s6, %s961_s29, %s843_s19, %s843_s19, %s844_s3  }
  0x5b PF: > { %p1106_p13 = scmp.ne.s32.totalorder %s1103_s23, 0 }
  0x5c   : > { %p1107_p7 = scmp.eq.s32.totalorder (!%p1106_p13), %s884_s13, 0 }
  0x5d   : > { %152 = sbr.rel (%p1106_p13) target bundleno = 392 (0x188), region = 28 }
  0x64   : > { %812 = dma.done.wait (%p1107_p7), [#allocation3], 576   ;;  %p1108_p8 = pmov %p1107_p7 }
  0x65   : > { %s1005_s4 = sand.u32 1, %s829_s10   ;;  %p1109_p6 = scmp.ne.s32.totalorder %s1100_s20, 0 }
  0x66   : > { %814 = vsyncadd (%p1108_p8), [#allocation3], 4294966720  ;;  %s552_s7 = sshll.u32 %s1005_s4, 5  ;;  %s159_s26 = scalar_lea.sflag [#allocation6], %s1005_s4 }
  0x67   : > { %s162_s29 = scalar_lea.vmem [#allocation5], %s552_s7 }
  0x68   : > { %816 = dma.done.wait (%p1109_p6), %s159_s26, 512  }
  0x69   : > { %818 = vsyncadd (%p1109_p6), %s159_s26, 4294966784  ;;  %v706_v0 = vld [vmem:[#allocation2] sm:$0xff]   ;;  %v707_v1 = vld [vmem:[#allocation2 + $0x8] sm:$0xff]   ;;  %vm246_vm0 = vcmask 588800   ;;  %vm253_vm1 = vcmask 1043456   ;;  %s182_s20 = scalar_lea.vmem [#allocation7], %s552_s7 }
  0x6a   : > { %611 = vmatprep.subr.bf16.mxu0 %v706_v0  ;;  %597 = vmatprep.subr.bf16.mxu1 %v706_v0  ;;  %v708_v2 = vld [vmem:[#allocation2 + $0x10] sm:$0xff]   ;;  %v203_v3 = vld [vmem:[%s162_s29] sm:$0xff]  ;;  %v206_v7 = vld [vmem:[%s162_s29 + $0x18] sm:$0xff]  ;;  %s435_s23 = scalar_lea.sflag [#allocation4], %s1005_s4  ;;  %p1110_p9 = scmp.ne.s32.totalorder %s1101_s21, 0 }
  0x6b   : > { %612 = vmatpush3.bf16.msra.mxu0 %v706_v0  ;;  %598 = vmatpush3.bf16.msra.mxu1 %v706_v0  ;;  %v204_v4 = vld [vmem:[%s162_s29 + $0x8] sm:$0xff]  ;;  %v205_v6 = vld [vmem:[%s162_s29 + $0x10] sm:$0xff]  ;;  %v710_v15 = vld [vmem:[#allocation2 + $0x20] ss:$0 sps:$4 sm:$0xff]   ;;  %s566_s5 = sshll.u32 (%p1110_p9), %s884_s13, 2 }
  0x6c   : > { %613 = vmatprep.subr.bf16.mxu0 %v707_v1  ;;  %599 = vmatprep.subr.bf16.mxu1 %v707_v1  ;;  %v207_v5 = vpack.c.bf16 %v204_v4, %v203_v3  ;;  %v709_v8 = vld [vmem:[#allocation2 + $0x18] sm:$0xff]   ;;  %v208_v11 = vpack.c.bf16 %v206_v7, %v205_v6  ;;  %v255_v21 = vsel %vm253_vm1, %v710_v15, 0  ;;  %s443_s6 = ssub.s32 (%p1110_p9), 7, %s566_s5 }
  0x6d   : > { %p444_p10 = scmp.lt.s32.totalorder (%p1110_p9), %s443_s6, 4 }
  0x6e   : > { %621 = vmatprep.mubr.msk.bf16.mxu0 %vm246_vm0, %v207_v5  ;;  %v209_v9 = vunpack.c.l.bf16 %v207_v5  ;;  %v210_v10 = vunpack.c.h.bf16 %v207_v5  ;;  %v211_v14 = vunpack.c.l.bf16 %v208_v11  ;;  %v212_v17 = vunpack.c.h.bf16 %v208_v11 }
  0x6f   : > { %614 = vmatpush3.bf16.msra.mxu0 %v707_v1  ;;  %600 = vmatpush3.bf16.msra.mxu1 %v707_v1 }
  0x70   : > { %615 = vmatprep.subr.bf16.mxu0 %v708_v2  ;;  %601 = vmatprep.subr.bf16.mxu1 %v708_v2  ;;  %v213_v12 = vsub.f32 %v203_v3, %v209_v9  ;;  %v214_v13 = vsub.f32 %v204_v4, %v210_v10  ;;  %v215_v20 = vsub.f32 %v205_v6, %v211_v14 }
  0x71   : > { %v216_v24 = vsub.f32 %v206_v7, %v212_v17 }
  0x72   : > { %v217_v16 = vpack.c.bf16 %v214_v13, %v213_v12 }
  0x73   : > { %616 = vmatpush3.bf16.msra.mxu0 %v708_v2  ;;  %602 = vmatpush3.bf16.msra.mxu1 %v708_v2  ;;  %v218_v26 = vpack.c.bf16 %v216_v24, %v215_v20 }
  0x74   : > { %617 = vmatprep.subr.bf16.mxu0 %v709_v8  ;;  %603 = vmatprep.subr.bf16.mxu1 %v709_v8  ;;  %v361_v18 = vunpack.c.l.bf16 %v217_v16  ;;  %v362_v19 = vunpack.c.h.bf16 %v217_v16 }
  0x75   : > { %607 = vmatprep.mubr.msk.bf16.mxu1 %vm246_vm0, %v217_v16  ;;  %v363_v27 = vunpack.c.l.bf16 %v218_v26  ;;  %v364_v28 = vunpack.c.h.bf16 %v218_v26 }
  0x76   : > { %v365_v22 = vsub.f32 %v213_v12, %v361_v18  ;;  %v366_v23 = vsub.f32 %v214_v13, %v362_v19 }
  0x77   : > { %618 = vmatpush3.bf16.msra.mxu0 %v709_v8  ;;  %604 = vmatpush3.bf16.msra.mxu1 %v709_v8  ;;  %v367_v29 = vsub.f32 %v215_v20, %v363_v27  ;;  %v368_v30 = vsub.f32 %v216_v24, %v364_v28 }
  0x78   : > { %648 = vmatprep.subr.msk.bf16.mxu0 %vm253_vm1, %v710_v15  ;;  %647 = vmatprep.subr.msk.bf16.mxu1 %vm253_vm1, %v710_v15  ;;  %v369_v25 = vpack.c.bf16 %v366_v23, %v365_v22 }
  0x79   : > { %v370_v31 = vpack.c.bf16 %v368_v30, %v367_v29 }
  0x7b   : > { %620 = vmatpush3.bf16.msra.mxu0 %v255_v21  ;;  %606 = vmatpush3.bf16.msra.mxu1 %v255_v21 }
  0x7c   : > { %625 = vmatprep.subr.bf16.mxu0 %v706_v0 }
  0x7e   : > { %622 = vmatmul.mubr.msk.bf16.vlgmr.msra.gmra.mrb[0].mxu0 %vm246_vm0, %v208_v11  ;;  %608 = vmatmul.mubr.msk.bf16.vlgmr.msra.gmra.mrb[0].mxu1 %vm246_vm0, %v218_v26 }
  0x7f   : > { %626 = vmatpush3.bf16.msra.mxu0 %v706_v0  ;;  %635 = vmatprep.mubr.msk.bf16.mxu0 %vm246_vm0, %v369_v25 }
  0x80   : > { %627 = vmatprep.subr.bf16.mxu0 %v707_v1 }
  0x83   : > { %628 = vmatpush3.bf16.msra.mxu0 %v707_v1 }
  0x84   : > { %629 = vmatprep.subr.bf16.mxu0 %v708_v2 }
  0x87   : > { %630 = vmatpush3.bf16.msra.mxu0 %v708_v2 }
  0x88   : > { %631 = vmatprep.subr.bf16.mxu0 %v709_v8 }
  0x8b   : > { %632 = vmatpush3.bf16.msra.mxu0 %v709_v8 }
  0x8c   : > { %649 = vmatprep.subr.msk.bf16.mxu0 %vm253_vm1, %v710_v15 }
  0x8f   : > { %634 = vmatpush3.bf16.msra.mxu0 %v255_v21 }
  0x92   : > { %636 = vmatmul.mubr.msk.bf16.vlgmr.msra.gmra.mrb[0].mxu0 %vm246_vm0, %v370_v31 }
 0x151   : > { %v609_v32 = vpop.f32.mrb[0].mxu1 }
 0x152   : > { %v291_v33 = vpop.f32.mrb[1].mxu1 }
 0x153   : > { %v610_v34 = vpop.f32.mrb[2].mxu1 }
 0x154   : > { %v294_v35 = vpop.f32.mrb[3].mxu1 }
 0x165   : > { %v637_v36 = vpop.f32.mrb[0].mxu0  ;;  %441 = sbr.rel (!%p1110_p9) target bundleno = 392 (0x188), region = 40 }
 0x166   : > { %v639_v37 = vadd.f32 %v637_v36, %v609_v32  ;;  %v411_v38 = vpop.f32.mrb[1].mxu0 }
 0x167   : > { %v640_v39 = vadd.f32 %v411_v38, %v291_v33  ;;  %v638_v40 = vpop.f32.mrb[2].mxu0 }
 0x168   : > { %432 = vst.msk [vmem:[%s182_s20 + $0x10] sm:$0xff] %vm246_vm0, %v639_v37  ;;  %v641_v41 = vadd.f32 %v638_v40, %v610_v34  ;;  %v414_v42 = vpop.f32.mrb[3].mxu0 }
 0x169   : > { %430 = vst.msk [vmem:[%s182_s20] sm:$0xff] %vm246_vm0, %v640_v39  ;;  %v642_v43 = vadd.f32 %v414_v42, %v294_v35 }
 0x16a   : > { %433 = vst.msk [vmem:[%s182_s20 + $0x18] sm:$0xff] %vm246_vm0, %v641_v41 }
 0x16b   : > { %431 = vst.msk [vmem:[%s182_s20 + $0x8] sm:$0xff] %vm246_vm0, %v642_v43 }
 0x16c   : > { %s1119_s6 = smov (!%p444_p10, %s443_s6), 4 }
 0x16d   : > { %s1035_s8 = sshll.u32 %s1119_s6, 7 }
 0x16e   : > { %s448_s14 = ssub.s32 512, %s1035_s8 }
 0x16f   : > { %449 = vsyncadd %s435_s23, %s448_s14  ;;  %p568_p1 = scmp.ne.s32.totalorder %s1035_s8, 0  ;;  %s575_s16 = sshll.u32 %s884_s13, 9 }
 0x170   : > { %s1045_s24 = scalar_lea.hbm %s1095_s2, %s575_s16  ;;  %s454_s27 = sshll.u32 %s182_s20, 4  ;;  %s1047_s27 = int_to_ptr.vmem [resolvable:$true] %s454_s27 }
 0x171   : > { %s767_s28 = scalar_lea.vmem %s1047_s27, %s1035_s8  ;;  %s845_s25 = smov [#allocation7]  }
 0x172   : > { %p768_p4 = scmp.ne.s32.totalorder %s1047_s27, %s767_s28  ;;  %s771_s30 = sshll.u32 %s845_s25, 4  ;;  %s772_s30 = int_to_ptr.vmem [resolvable:$false] %s771_s30 }
 0x173   : > { %s773_s13 = scalar_lea.vmem %s772_s30, 1024  ;;  %p774_p12 = scmp.lt.s32.totalorder %s1047_s27, %s772_s30 }
 0x174   : > { %p769_p5 = pnand %p768_p4, %p568_p1  ;;  %p775_p2 = scmp.lt.s32.totalorder %s773_s13, %s767_s28 }
 0x176   : > { %p770_p11 = pneg %p769_p5  ;;  %p776_p3 = por %p775_p2, %p774_p12 }
 0x178   : > { %p777_p13 = pnand %p776_p3, %p770_p11 }
 0x17a   : > { %780 = shalt.err (!%p777_p13)
}
 0x17b   : > { %s781_s19 = scalar_lea.hbm %s1045_s24, %s1035_s8  ;;  %s785_s26 = scalar_lea.hbm %s1095_s2, 896 }
 0x17c   : > { %p782_p7 = scmp.ne.s32.totalorder %s1045_s24, %s781_s19  ;;  %p786_p9 = scmp.lt.u32.totalorder %s1045_s24, %s1095_s2 }
 0x17d   : > { %p787_p10 = scmp.lt.u32.totalorder %s785_s26, %s781_s19  ;;  %p789_p5 = scmp.lt.u32.totalorder %s781_s19, %s1045_s24 }
 0x17e   : > { %p783_p8 = pnand %p782_p7, %p568_p1 }
 0x17f   : > { %p788_p4 = por %p787_p10, %p786_p9 }
 0x180   : > { %p784_p6 = pneg %p783_p8 }
 0x181   : > { %p790_p11 = por %p789_p5, %p788_p4 }
 0x183   : > { %p791_p12 = pnand %p790_p11, %p784_p6 }
 0x185   : > { %794 = shalt.err (!%p791_p12)
}
 0x186   : > { %s846_s5 = smov 128   ;;  %s847_s6 = smov 8  }
 0x187   : > { %460 = dma.vmem_to_hbm [thread:$0]  (%p568_p1), %s1047_s27, %s1035_s8, %s1045_s24, %s435_s23, %s846_s5, %s846_s5, %s847_s6  }
 0x188 PF: > { %s469_s14 = sand.u32 1, %s825_s9   ;;  %p1111_p2 = scmp.ne.s32.totalorder %s1102_s22, 0 }
 0x189   : > { %s470_s16 = scalar_lea.sflag [#allocation4], %s469_s14 }
 0x18a   : > { %p661_p3 = pnand %p542_p0, %p1111_p2 }
 0x18c   : > { %820 = dma.done.wait (!%p661_p3), %s470_s16, 512  }
 0x18d   : > { %822 = vsyncadd (!%p661_p3), %s470_s16, 4294966784  ;;  %p16_p13 = scmp.ge.s32.totalorder %s888_s15, 4   ;;  %s1112_s9 = smov %s829_s10 }
 0x18e   : > { %s1113_s10 = smov %s833_s11  ;;  %s1114_s11 = smov %s900_s18 }
 0x18f   : > { %s1115_s12 = smov %s888_s15  ;;  %18 = sbr.rel (!%p16_p13) target bundleno = 6 (0x6), region = 78 }
 0x196   :  { %475 = vsyncpa [#allocation3], 1 }
 0x197   :  { %477 = vsyncpa [#allocation3 + $0x1], 1 }
 0x198   :  { %478 = vsyncpa [#allocation6], 1 }
 0x199   :  { %480 = vsyncpa [#allocation6 + $0x1], 1 }
 0x19a   :  { %481 = vsyncpa [#allocation4], 1 }
 0x19b   :  { %483 = vsyncpa [#allocation4 + $0x1], 1 }

</bundles_post_ra>
